<compile_context>
chip_gen: v5e
topology: v5e:2x2
jax: 0.10.0
libtpu: 0.0.40
codegen_flags: <defaults>
</compile_context>

<pallas_src>
import jax
import jax.numpy as jnp
from jax import lax
from jax.experimental import pallas as pl
from jax.experimental.pallas import tpu as pltpu

ALPHA = 0.5
SMOOTHING = 0.1


def _make_ols_kernel(total_b: int, tile_b: int):
    def kernel(yh_ref, w_ref, out_ref):
        i = pl.program_id(0)
        base = i * tile_b

        logits = yh_ref[...].astype(jnp.float32)                # (TB, C)
        w = w_ref[...]                                          # (TB, C) f32

        # Numerically stable logsumexp per row.
        m = jnp.max(logits, axis=-1, keepdims=True)             # (TB, 1)
        z = logits - m
        lse = jnp.log(jnp.sum(jnp.exp(z), axis=-1, keepdims=True))  # (TB, 1)

        # Exact fold of  -sum_c( w * log_softmax(logits) ):
        #   log_softmax = logits - m - lse
        #   -sum(w * logp) = (m + lse) * sum(w) - sum(w * logits)
        # (holds for arbitrary w; does NOT assume rows of w sum to 1).
        w_sum = jnp.sum(w, axis=-1, keepdims=True)              # (TB, 1)
        w_dot = jnp.sum(w * logits, axis=-1, keepdims=True)     # (TB, 1)
        per_row = (m + lse) * w_sum - w_dot                     # (TB, 1)

        # Mask tail rows of the last (padded) tile so the batch mean is exact.
        rows = lax.broadcasted_iota(jnp.int32, (tile_b, 1), 0)
        valid = (base + rows) < total_b
        tile_sum = jnp.sum(jnp.where(valid, per_row, 0.0))

        out_ref[...] = jnp.broadcast_to(tile_sum, out_ref.shape).astype(jnp.float32)

    return kernel


def _physical_vmem_bytes() -> int:
    try:
        info = pltpu.get_tpu_info()
        return int(getattr(info, "vmem_capacity_bytes", 64 << 20))
    except Exception:                                           # interpret / old jax
        return 64 << 20


def _pick_tile(b: int, c: int, in_bytes: int, budget: int, max_tile: int) -> int:
    if b <= 16:
        return b
    # Per-row working set:
    #   2 pipelined logits buffers (native dtype) + 2 pipelined W-row buffers
    #   (f32) + ~4 f32 full-tile temporaries (cast / z / exp / w*logits).
    per_row = c * (2 * in_bytes + 2 * 4 + 4 * 4)
    tb = budget // max(per_row, 1)
    tb = min(tb, max_tile)
    # Keep >= 2 grid steps so the "parallel" batch axis can shard across the
    # two TensorCores on v7x (and the pipeline has something to overlap).
    half = (((b + 1) // 2) + 15) // 16 * 16
    tb = min(tb, half)
    tb = max(16, (tb // 16) * 16)
    return tb


def online_label_smoothing_loss(y_h, y, supervise, alpha: float = ALPHA,
                                *, one_hot_labels=None, max_tile_b: int = 1024):
    """Forward pass of OnlineLabelSmoothing (loss value only)."""
    B, C = y_h.shape

    # _convert_one_hot_to_label: torch does a runtime allclose() check which
    # forces a device->host sync and breaks under jit; resolve it statically
    # when inputs are concrete, otherwise callers pass `one_hot_labels`.
    if one_hot_labels is None:
        try:
            row_sums = jnp.sum(y_h.astype(jnp.float32), axis=-1)
            one_hot_labels = bool(jnp.allclose(row_sums, jnp.ones_like(row_sums)))
        except jax.errors.ConcretizationTypeError:
            one_hot_labels = False
    if one_hot_labels:
        y = jnp.argmax(y_h, axis=-1)

    # TODO(synk): the training-mode `step()` buffer update (index_add_ into
    # `update` / `idx_count`) is a stateful side effect that does not affect
    # the returned loss; it is not implemented here.

    y_i32 = y.astype(jnp.int32).reshape(B)

    # Fused per-row weight vectors (O(B*C); no per-call CxC build):
    #   w_rows[b] = alpha * onehot(y_b) + (1 - alpha) * supervise[:, y_b]
    # so hard CE + soft loss collapse into a single -w_rows . logp reduction.
    true_dist = jnp.take(supervise.astype(jnp.float32), y_i32, axis=1).T   # (B, C)
    w_rows = (1.0 - alpha) * true_dist
    w_rows = w_rows.at[jnp.arange(B), y_i32].add(jnp.float32(alpha))

    in_bytes = jnp.dtype(y_h.dtype).itemsize
    phys_vmem = _physical_vmem_bytes()
    budget = max(16 << 20, min(phys_vmem // 2, 64 << 20))      # working-set budget

    tb = _pick_tile(B, C, in_bytes, budget, max_tile_b)
    num_tiles = (B + tb - 1) // tb

    vmem_need = tb * C * (2 * in_bytes + 2 * 4 + 4 * 4) + 2 * 8 * 128 * 4
    vmem_limit = int(min(max(vmem_need + (4 << 20), 32 << 20),
                         max(32 << 20, (phys_vmem * 3) // 4)))

    grid_spec = pltpu.PrefetchScalarGridSpec(
        num_scalar_prefetch=0,
        grid=(num_tiles,),
        in_specs=[
            pl.BlockSpec((tb, C), lambda i: (i, 0)),   # logits tile (native dtype)
            pl.BlockSpec((tb, C), lambda i: (i, 0)),   # pre-gathered W rows (f32)
        ],
        out_specs=pl.BlockSpec((1, 8, 128), lambda i: (i, 0, 0)),
    )

    partials = pl.pallas_call(
        _make_ols_kernel(B, tb),
        out_shape=jax.ShapeDtypeStruct((num_tiles, 8, 128), jnp.float32),
        grid_spec=grid_spec,
        compiler_params=pltpu.CompilerParams(
            dimension_semantics=("parallel",),
            vmem_limit_bytes=vmem_limit,
        ),
    )(y_h, w_rows)

    # Tail rows are masked in-kernel, so a plain sum / B is the exact mean.
    return jnp.sum(partials[:, 0, 0]) / jnp.float32(B)


def _reference_loss(y_h, y, supervise, alpha):
    logp = jax.nn.log_softmax(y_h.astype(jnp.float32), axis=-1)
    true_dist = supervise[:, y].T
    soft = jnp.mean(jnp.sum(-true_dist * logp, axis=-1))
    hard = jnp.mean(-logp[jnp.arange(y_h.shape[0]), y])
    return alpha * hard + (1.0 - alpha) * soft


if __name__ == "__main__":
    key = jax.random.PRNGKey(0)
    # Small shapes; B chosen so the batch grid has >= 2 steps and a masked
    # tail tile (40 rows -> tb=32 -> 2 grid steps, second one 8/32 valid).
    B, C = 40, 128

    k1, k2 = jax.random.split(key)
    y_h = jax.random.normal(k1, (B, C), dtype=jnp.float32)
    y = jax.random.randint(k2, (B,), 0, C, dtype=jnp.int32)

    # Deterministic buffer init, matching the module's __init__:
    #   full((C, C), smoothing / (C - 1)) with diagonal = 1 - smoothing.
    supervise = jnp.full((C, C), SMOOTHING / (C - 1), dtype=jnp.float32)
    supervise = supervise.at[jnp.arange(C), jnp.arange(C)].set(1.0 - SMOOTHING)

    loss = online_label_smoothing_loss(y_h, y, supervise, alpha=ALPHA)
    jax.block_until_ready(loss)

    ref = _reference_loss(y_h, y, supervise, ALPHA)
    assert jnp.allclose(loss, ref, rtol=1e-5, atol=1e-4), (loss, ref)

    print("KERNEL_OK")
</pallas_src>

<mosaic_0001>
module attributes {stable_mosaic.version = 11 : i64} {
  func.func @kernel(%arg0: i32, %arg1: memref<32x128xf32, #tpu.memory_space<vmem>>, %arg2: memref<32x128xf32, #tpu.memory_space<vmem>>, %arg3: memref<1x8x128xf32, #tpu.memory_space<vmem>>) attributes {dimension_semantics = [#tpu.dimension_semantics<parallel>], iteration_bounds = array<i64: 2>, scalar_prefetch = 0 : i64, scratch_operands = 0 : i64, tpu.core_type = #tpu.core_type<tc>, window_params = [{transform_indices = @transform_0, window_bounds = array<i64: 32, 128>}, {transform_indices = @transform_1, window_bounds = array<i64: 32, 128>}, {transform_indices = @transform_2, window_bounds = array<i64: 1, 8, 128>}]} {
    %c32_i32 = arith.constant 32 : i32
    %0 = arith.muli %arg0, %c32_i32 : i32
    %c0 = arith.constant 0 : index
    %c0_0 = arith.constant 0 : index
    %1 = vector.load %arg1[%c0, %c0_0] : memref<32x128xf32, #tpu.memory_space<vmem>>, vector<32x128xf32>
    %c0_1 = arith.constant 0 : index
    %c0_2 = arith.constant 0 : index
    %2 = vector.load %arg2[%c0_1, %c0_2] : memref<32x128xf32, #tpu.memory_space<vmem>>, vector<32x128xf32>
    %cst = arith.constant dense<0xFF800000> : vector<32xf32>
    %3 = vector.multi_reduction <maximumf>, %1, %cst [1] : vector<32x128xf32> to vector<32xf32>
    %4 = vector.shape_cast %3 : vector<32xf32> to vector<32x1xf32>
    %5 = vector.broadcast %4 : vector<32x1xf32> to vector<32x128xf32>
    %6 = arith.subf %1, %5 : vector<32x128xf32>
    %7 = math.exp %6 : vector<32x128xf32>
    %cst_3 = arith.constant dense<0.000000e+00> : vector<32xf32>
    %8 = vector.multi_reduction <add>, %7, %cst_3 [1] : vector<32x128xf32> to vector<32xf32>
    %9 = vector.shape_cast %8 : vector<32xf32> to vector<32x1xf32>
    %10 = math.log %9 : vector<32x1xf32>
    %cst_4 = arith.constant dense<0.000000e+00> : vector<32xf32>
    %11 = vector.multi_reduction <add>, %2, %cst_4 [1] : vector<32x128xf32> to vector<32xf32>
    %12 = vector.shape_cast %11 : vector<32xf32> to vector<32x1xf32>
    %13 = arith.mulf %2, %1 : vector<32x128xf32>
    %cst_5 = arith.constant dense<0.000000e+00> : vector<32xf32>
    %14 = vector.multi_reduction <add>, %13, %cst_5 [1] : vector<32x128xf32> to vector<32xf32>
    %15 = vector.shape_cast %14 : vector<32xf32> to vector<32x1xf32>
    %16 = arith.addf %4, %10 : vector<32x1xf32>
    %17 = arith.mulf %16, %12 : vector<32x1xf32>
    %18 = arith.subf %17, %15 : vector<32x1xf32>
    %19 = tpu.iota {dimensions = array<i32: 0>} : vector<32x1xi32>
    %20 = vector.broadcast %0 : i32 to vector<32x1xi32>
    %21 = arith.addi %20, %19 : vector<32x1xi32>
    %c40_i32 = arith.constant 40 : i32
    %22 = vector.broadcast %c40_i32 : i32 to vector<32x1xi32>
    %23 = arith.cmpi slt, %21, %22 : vector<32x1xi32>
    %cst_6 = arith.constant 0.000000e+00 : f32
    %24 = vector.broadcast %cst_6 : f32 to vector<32x1xf32>
    %25 = arith.select %23, %18, %24 : vector<32x1xi1>, vector<32x1xf32>
    %26 = vector.shape_cast %25 : vector<32x1xf32> to vector<1x32x1xf32>
    %cst_7 = arith.constant dense<0.000000e+00> : vector<1xf32>
    %27 = vector.multi_reduction <add>, %26, %cst_7 [1, 2] : vector<1x32x1xf32> to vector<1xf32>
    %28 = vector.shape_cast %27 : vector<1xf32> to vector<1x1x1xf32>
    %29 = vector.extract %28[0, 0, 0] : f32 from vector<1x1x1xf32>
    %30 = vector.broadcast %29 : f32 to vector<1x8x128xf32>
    %c0_8 = arith.constant 0 : index
    %c0_9 = arith.constant 0 : index
    %c0_10 = arith.constant 0 : index
    %31 = vector.load %arg3[%c0_8, %c0_9, %c0_10] : memref<1x8x128xf32, #tpu.memory_space<vmem>>, vector<1x8x128xf32>
    tpu.vector_store %arg3[%c0_8, %c0_9, %c0_10], %30 {strides = array<i32>} : memref<1x8x128xf32, #tpu.memory_space<vmem>>, vector<1x8x128xf32>,
    return
  }
  func.func @transform_0(%arg0: i32) -> (i32, i32) {
    %c0_i32 = arith.constant 0 : i32
    %c0_i32_0 = arith.constant 0 : i32
    return %arg0, %c0_i32 : i32, i32
  }
  func.func @transform_1(%arg0: i32) -> (i32, i32) {
    %c0_i32 = arith.constant 0 : i32
    %c0_i32_0 = arith.constant 0 : i32
    return %arg0, %c0_i32 : i32, i32
  }
  func.func @transform_2(%arg0: i32) -> (i32, i32, i32) {
    %c0_i32 = arith.constant 0 : i32
    %c0_i32_0 = arith.constant 0 : i32
    %c0_i32_1 = arith.constant 0 : i32
    return %arg0, %c0_i32, %c0_i32_0 : i32, i32, i32
  }
}

</mosaic_0001>

<bundles_post_ra>
// kernel: tpu_custom_call.1
= control target key start
LH: loop header
LB: loop body
LE: loop exit
PB: predicated region body
PF: predicated region fallthrough
CT: control target
= control target key end

     0   :  { %7 = vsyncpa [#allocation3], 0  ;;  %s937_s0 = inlined_call_operand.hbm [shape: f32[40,128], index: 0, kind: input, shape index: {}]   ;;  %s938_s1 = inlined_call_operand.hbm [shape: f32[40,128], index: 1, kind: input, shape index: {}]   ;;  %s939_s2 = inlined_call_operand.hbm [shape: f32[2,8,128], index: 2, kind: output, shape index: {}]  }
   0x1   :  { %9 = vsyncpa [#allocation3 + $0x1], 0 }
   0x2   :  { %10 = vsyncpa [#allocation6], 0 }
   0x3   :  { %12 = vsyncpa [#allocation6 + $0x1], 0 }
   0x4   :  { %13 = vsyncpa [#allocation4], 0 }
   0x5   :  { %15 = vsyncpa [#allocation4 + $0x1], 0  ;;  %s715_s9 = smov 0   ;;  %s717_s10 = smov 0  }
   0x6   :  { %s719_s11 = smov 0   ;;  %s721_s12 = smov 0  }
   0x7 LB: > { %s736_s13 = sadd.s32 4294967295, %s692_s12   ;;  %s453_s14 = sadd.s32 4294967294, %s692_s12   ;;  %s692_s12 = sphi %s721_s12, %s952_s12   ;;  %s688_s11 = sphi %s719_s11, %s951_s11   ;;  %s684_s10 = sphi %s717_s10, %s950_s10   ;;  %s680_s9 = sphi %s715_s9, %s949_s9  }
   0x8   : > { %s740_s15 = sadd.s32 1, %s692_s12   ;;  %s28_s16 = sadd.s32 1, %s688_s11 }
   0x9   : > { %s25_s17 = ssub.s32 %s692_s12, %s740_s15  ;;  %p35_p0 = scmp.ne.s32.totalorder %s688_s11, %s684_s10 }
   0xa   : > { %p26_p1 = scmp.eq.s32.totalorder %s25_s17, 0  ;;  %p36_p2 = scmp.eq.s32.totalorder %s692_s12, 0 }
   0xb   : > { %p41_p3 = scmp.ne.s32.totalorder %s684_s10, %s680_s9  ;;  %p42_p4 = scmp.eq.s32.totalorder %s736_s13, 0 }
   0xc   : > { %s752_s18 = scalar_select %p26_p1, %s688_s11, %s28_s16  }
   0xd   : > { %p754_p5 = por %p36_p2, %p35_p0  ;;  %p758_p6 = por %p42_p4, %p41_p3 }
   0xe   : > { %p91_p7 = scmp.eq.s32.totalorder %s736_s13, 1  ;;  %p97_p8 = scmp.eq.s32.totalorder %s453_s14, 1 }
   0xf   : > { %p940_p11 = scmp.ge.s32.totalorder %s692_s12, 2 }
  0x10   : > { %p763_p9 = por %p91_p7, %p35_p0  ;;  %p767_p10 = por %p97_p8, %p41_p3 }
  0x11   : > { %113 = sbr.rel (%p940_p11) target bundleno = 94 (0x5e), region = 16 }
  0x12   : > { %s944_s22 = scalar_select %p767_p10, 1, 0 }
  0x16   : > { %116 = sbr.rel (!%p754_p5) target bundleno = 58 (0x3a), region = 20  ;;  %s117_s23 = sand.u32 (%p754_p5), 1, %s688_s11  }
  0x17   : > { %s457_s24 = sshll.u32 (%p754_p5), %s692_s12, 2  ;;  %s456_s25 = sshll.u32 (%p754_p5), %s117_s23, 5 }
  0x18   : > { %s123_s26 = ssub.s32 (%p754_p5), 5, %s457_s24  ;;  %s781_s30 = scalar_lea.sflag (%p754_p5), [#allocation3], %s117_s23 }
  0x19   : > { %p124_p12 = scmp.lt.s32.totalorder (%p754_p5), %s123_s26, 4  ;;  %s121_s3 = scalar_lea.vmem (%p754_p5), [#allocation2], %s456_s25 }
  0x1b   : > { %s954_s26 = smov (!%p124_p12, %s123_s26), 4 }
  0x1c   : > { %s458_s27 = sshll.u32 %s954_s26, 3 }
  0x1d   : > { %s127_s28 = ssub.s32 32, %s458_s27 }
  0x1e   : > { %s128_s29 = sshll.u32 %s127_s28, 4 }
  0x1f   : > { %129 = vsyncadd %s781_s30, %s128_s29  ;;  %p784_p13 = scmp.ne.s32.totalorder %s458_s27, 0  ;;  %s479_s5 = sshll.u32 %s692_s12, 5 }
  0x20   : > { %s132_s8 = scalar_lea.hbm %s937_s0, %s479_s5  ;;  %s792_s14 = sshll.u32 %s121_s3, 4  ;;  %s137_s14 = int_to_ptr.vmem [resolvable:$true] %s792_s14 }
  0x21   : > { %s134_s16 = sshll.u32 %s132_s8, 4  ;;  %s462_s17 = sshll.u32 %s954_s26, 7  ;;  %s795_s16 = int_to_ptr.hbm [resolvable:$true] %s134_s16 }
  0x22   : > { %s544_s23 = sshra.s32 %s795_s16, 4  ;;  %s546_s24 = sshrl.u32 %s462_s17, 4  ;;  %s545_s23 = int_to_ptr.hbm [resolvable:$true] %s544_s23 }
  0x23   : > { %s551_s25 = scalar_lea.hbm %s545_s23, %s546_s24  ;;  %s555_s29 = scalar_lea.hbm %s937_s0, 40 }
  0x24   : > { %p552_p0 = scmp.ne.s32.totalorder %s545_s23, %s551_s25  ;;  %p556_p3 = scmp.lt.s32.totalorder %s545_s23, %s937_s0 }
  0x25   : > { %p557_p4 = scmp.lt.s32.totalorder %s555_s29, %s551_s25 }
  0x26   : > { %p553_p1 = pnand %p552_p0, %p784_p13 }
  0x27   : > { %p558_p7 = por %p557_p4, %p556_p3 }
  0x28   : > { %p554_p2 = pneg %p553_p1 }
  0x2a   : > { %p559_p8 = pnand %p558_p7, %p554_p2 }
  0x2c   : > { %562 = shalt.err (!%p559_p8)
}
  0x2d   : > { %s563_s6 = sshra.s32 %s137_s14, 4  ;;  %s694_s8 = smov [#allocation2]   ;;  %s564_s6 = int_to_ptr.vmem [resolvable:$true] %s563_s6 }
  0x2e   : > { %s570_s7 = scalar_lea.vmem %s564_s6, %s546_s24  ;;  %s574_s27 = scalar_lea.vmem %s694_s8, 64 }
  0x2f   : > { %p571_p12 = scmp.ne.s32.totalorder %s564_s6, %s570_s7  ;;  %p576_p11 = scmp.lt.s32.totalorder %s574_s27, %s570_s7 }
  0x31   : > { %p572_p0 = pnand %p571_p12, %p784_p13 }
  0x33   : > { %p573_p1 = pneg %p572_p0 }
  0x35   : > { %p578_p10 = pnand %p576_p11, %p573_p1 }
  0x37   : > { %581 = shalt.err (!%p578_p10)
}
  0x38   : > { %s695_s23 = smov 128   ;;  %s696_s25 = smov 8  }
  0x39   : > { %142 = dma.hbm_to_vmem [thread:$0]  (%p784_p13), %s795_s16, %s462_s17, %s137_s14, %s781_s30, %s695_s23, %s695_s23, %s696_s25  }
  0x3a PF: > { %145 = sbr.rel (!%p754_p5) target bundleno = 94 (0x5e), region = 24  ;;  %s146_s24 = sand.u32 (%p754_p5), 1, %s688_s11  }
  0x3b   : > { %s464_s28 = sshll.u32 (%p754_p5), %s692_s12, 2  ;;  %s463_s29 = sshll.u32 (%p754_p5), %s146_s24, 5 }
  0x3c   : > { %s152_s3 = ssub.s32 (%p754_p5), 5, %s464_s28  ;;  %s828_s7 = scalar_lea.sflag (%p754_p5), [#allocation6], %s146_s24 }
  0x3d   : > { %p153_p10 = scmp.lt.s32.totalorder (%p754_p5), %s152_s3, 4  ;;  %s150_s26 = scalar_lea.vmem (%p754_p5), [#allocation5], %s463_s29 }
  0x3f   : > { %s956_s3 = smov (!%p153_p10, %s152_s3), 4 }
  0x40   : > { %s465_s5 = sshll.u32 %s956_s3, 3 }
  0x41   : > { %s156_s6 = ssub.s32 32, %s465_s5 }
  0x42   : > { %s157_s4 = sshll.u32 %s156_s6, 4 }
  0x43   : > { %158 = vsyncadd %s828_s7, %s157_s4  ;;  %p831_p5 = scmp.ne.s32.totalorder %s465_s5, 0  ;;  %s480_s30 = sshll.u32 %s692_s12, 5 }
  0x44   : > { %s161_s17 = scalar_lea.hbm %s938_s1, %s480_s30  ;;  %s839_s8 = sshll.u32 %s150_s26, 4  ;;  %s166_s8 = int_to_ptr.vmem [resolvable:$true] %s839_s8 }
  0x45   : > { %s163_s27 = sshll.u32 %s161_s17, 4  ;;  %s469_s23 = sshll.u32 %s956_s3, 7  ;;  %s842_s27 = int_to_ptr.hbm [resolvable:$true] %s163_s27 }
  0x46   : > { %s583_s25 = sshra.s32 %s842_s27, 4  ;;  %s585_s24 = sshrl.u32 %s469_s23, 4  ;;  %s584_s25 = int_to_ptr.hbm [resolvable:$true] %s583_s25 }
  0x47   : > { %s590_s28 = scalar_lea.hbm %s584_s25, %s585_s24  ;;  %s594_s6 = scalar_lea.hbm %s938_s1, 40 }
  0x48   : > { %p591_p11 = scmp.ne.s32.totalorder %s584_s25, %s590_s28  ;;  %p595_p3 = scmp.lt.s32.totalorder %s584_s25, %s938_s1 }
  0x49   : > { %p596_p4 = scmp.lt.s32.totalorder %s594_s6, %s590_s28 }
  0x4a   : > { %p592_p13 = pnand %p591_p11, %p831_p5 }
  0x4b   : > { %p597_p7 = por %p596_p4, %p595_p3 }
  0x4c   : > { %p593_p2 = pneg %p592_p13 }
  0x4e   : > { %p598_p8 = pnand %p597_p7, %p593_p2 }
  0x50   : > { %601 = shalt.err (!%p598_p8)
}
  0x51   : > { %s602_s30 = sshra.s32 %s166_s8, 4  ;;  %s697_s16 = smov [#allocation5]   ;;  %s603_s30 = int_to_ptr.vmem [resolvable:$true] %s602_s30 }
  0x52   : > { %s609_s14 = scalar_lea.vmem %s603_s30, %s585_s24  ;;  %s613_s17 = scalar_lea.vmem %s697_s16, 64 }
  0x53   : > { %p610_p12 = scmp.ne.s32.totalorder %s603_s30, %s609_s14  ;;  %p615_p10 = scmp.lt.s32.totalorder %s613_s17, %s609_s14 }
  0x55   : > { %p611_p0 = pnand %p610_p12, %p831_p5 }
  0x57   : > { %p612_p1 = pneg %p611_p0 }
  0x59   : > { %p617_p11 = pnand %p615_p10, %p612_p1 }
  0x5b   : > { %620 = shalt.err (!%p617_p11)
}
  0x5c   : > { %s698_s25 = smov 128   ;;  %s699_s28 = smov 8  }
  0x5d   : > { %171 = dma.hbm_to_vmem [thread:$0]  (%p831_p5), %s842_s27, %s469_s23, %s166_s8, %s828_s7, %s698_s25, %s698_s25, %s699_s28  }
  0x5e PF: > { %p470_p13 = scmp.ge.s32.totalorder %s692_s12, 1  ;;  %p173_p2 = scmp.lt.s32.totalorder %s692_s12, 3 }
  0x60   : > { %p174_p3 = pnand %p470_p13, %p173_p2 }
  0x61   : > { %s871_s24 = sand.u32 (!%p174_p3), 1, %s684_s10  }
  0x62   : > { %177 = sbr.rel (%p174_p3) target bundleno = 565 (0x235), region = 28  ;;  %s471_s29 = sshll.u32 (!%p174_p3), %s871_s24, 5 }
  0x63   : > { %s180_s5 = scalar_lea.sflag (!%p174_p3), [#allocation3], %s871_s24  ;;  %s183_s19 = scalar_lea.vmem (!%p174_p3), [#allocation2], %s471_s29 }
  0x67   : > { %667 = dma.done.wait (%p758_p6), %s180_s5, 512  }
  0x68   : > { %669 = vsyncadd (%p758_p6), %s180_s5, 4294966784  ;;  %s190_s3 = scalar_lea.sflag [#allocation6], %s871_s24  ;;  %s880_s7 = scalar_lea.vmem [#allocation5], %s471_s29 }
  0x69   : > { %671 = dma.done.wait (%p758_p6), %s190_s3, 512  }
  0x6a   : > { %673 = vsyncadd (%p758_p6), %s190_s3, 4294966784  ;;  %v233_v0 = vld [vmem:[%s183_s19 + $0x10] sm:$0xff]  ;;  %v231_v1 = vld [vmem:[%s183_s19] sm:$0xff]  ;;  %v307_v34 = vlaneseq  ;;  %s474_s20 = sshll.u32 %s736_s13, 5  ;;  %vm325_vm2 = vcmask 7168   ;;  %s473_s8 = sshll.u32 %s871_s24, 3 }
  0x6b   : > { %243 = vmax.xlane.f32.xlu1 %v233_v0  ;;  %239 = vmax.xlane.f32.xlu0 %v231_v1  ;;  %v234_v2 = vld [vmem:[%s183_s19 + $0x18] sm:$0xff]  ;;  %v232_v3 = vld [vmem:[%s183_s19 + $0x8] sm:$0xff]  ;;  %v235_v4 = vld [vmem:[%s880_s7] sm:$0xff]  ;;  %v312_v39 = vstv %s474_s20  ;;  %s476_s27 = sshll.u32 %s736_s13, 3  ;;  %s219_s26 = scalar_lea.vmem [#allocation7], %s473_s8 }
  0x6c   : > { %v236_v5 = vld [vmem:[%s880_s7 + $0x8] sm:$0xff]  ;;  %275 = vadd.xlane.f32.xlu2 %v235_v4  ;;  %v238_v23 = vld [vmem:[%s880_s7 + $0x18] sm:$0xff]  ;;  %v237_v25 = vld [vmem:[%s880_s7 + $0x10] sm:$0xff]  ;;  %v283_v26 = vmul.f32 %v235_v4, %v231_v1  ;;  %v308_v37 = vshrl.u32 %v307_v34, 7  ;;  %s355_s4 = scalar_lea.hbm %s939_s2, %s476_s27  ;;  %s357_s30 = sshll.u32 %s219_s26, 4  ;;  %s358_s30 = int_to_ptr.vmem [resolvable:$true] %s357_s30 }
  0x6d   : > { %v284_v20 = vmul.f32 %v236_v5, %v232_v3  ;;  %v286_v24 = vmul.f32 %v238_v23, %v234_v2  ;;  %v285_v27 = vmul.f32 %v237_v25, %v233_v0  ;;  %s359_s14 = sshll.u32 %s355_s4, 4  ;;  %s345_s17 = scalar_lea.sflag [#allocation4], %s871_s24  ;;  %s360_s14 = int_to_ptr.hbm [resolvable:$true] %s359_s14 }
  0x6e   : > { %v309_v41 = vadd.s32 8, %v308_v37  ;;  %v313_v46 = vadd.s32 %v312_v39, %v308_v37  ;;  %v310_v50 = vadd.s32 16, %v308_v37  ;;  %v311_v53 = vadd.s32 24, %v308_v37  ;;  %s636_s25 = sshra.s32 %s360_s14, 4  ;;  %s642_s5 = scalar_lea.hbm %s939_s2, 16  ;;  %s637_s25 = int_to_ptr.hbm [resolvable:$true] %s636_s25 }
  0x6f   : > { %s638_s28 = scalar_lea.hbm %s637_s25, 8  ;;  %p643_p7 = scmp.lt.s32.totalorder %s637_s25, %s939_s2 }
  0x70   : > { %v314_v52 = vadd.s32 %v312_v39, %v309_v41  ;;  %vm317_vm0 = vcmp.lt.s32.totalorder %v313_v46, 40  ;;  %v315_v58 = vadd.s32 %v312_v39, %v310_v50  ;;  %v316_v60 = vadd.s32 %v312_v39, %v311_v53  ;;  %p639_p6 = scmp.ne.s32.totalorder %s637_s25, %s638_s28  ;;  %p644_p8 = scmp.lt.s32.totalorder %s642_s5, %s638_s28 }
  0x72   : > { %vm318_vm1 = vcmp.lt.s32.totalorder %v314_v52, 40  ;;  %vm319_vm3 = vcmp.lt.s32.totalorder %v315_v58, 40  ;;  %vm320_vm4 = vcmp.lt.s32.totalorder %v316_v60, 40  ;;  %p640_p5 = pnand %p639_p6, %p763_p9  ;;  %p645_p12 = por %p644_p8, %p643_p7 }
  0x73   : > { %245 = vmax.xlane.f32.xlu1 %v234_v2  ;;  %241 = vmax.xlane.f32.xlu0 %v232_v3 }
  0x74   : > { %p641_p4 = pneg %p640_p5 }
  0x76   : > { %p646_p0 = pnand %p645_p12, %p641_p4 }
  0x7b   : > { %277 = vadd.xlane.f32.xlu0 %v236_v5 }
  0xde   : > { %v888_v6 = vpop.xlane.xlu1 %243  ;;  %v240_v7 = vpop.xlane.xlu0 %239 }
  0xdf   : > { %v249_v8 = vsub.f32 %v233_v0, %v888_v6  ;;  %v247_v9 = vsub.f32 %v231_v1, %v240_v7  ;;  %v276_v28 = vpop.xlane.xlu2 %275 }
  0xe1   : > { %v255_v10 = vmul.f32 1.442695, %v249_v8  ;;  %v251_v11 = vmul.f32 1.442695, %v247_v9 }
  0xe3   : > { %528 = vpow2.f32 %v255_v10 }
  0xe4   : > { %530 = vpow2.f32 %v251_v11 }
  0xe6   : > { %v891_v12 = vpop.xlane.xlu1 %245  ;;  %v242_v13 = vpop.xlane.xlu0 %241 }
  0xe7   : > { %v250_v14 = vsub.f32 %v234_v2, %v891_v12  ;;  %v248_v15 = vsub.f32 %v232_v3, %v242_v13 }
  0xe9   : > { %v529_v16 = vpop.eup %528  ;;  %v257_v17 = vmul.f32 1.442695, %v250_v14  ;;  %v253_v18 = vmul.f32 1.442695, %v248_v15 }
  0xea   : > { %v531_v19 = vpop.eup %530  ;;  %263 = vadd.xlane.f32.xlu0 %v529_v16 }
  0xeb   : > { %532 = vpow2.f32 %v257_v17  ;;  %259 = vadd.xlane.f32.xlu2 %v531_v19 }
  0xec   : > { %534 = vpow2.f32 %v253_v18 }
  0xee   : > { %v278_v29 = vpop.xlane.xlu0 %277 }
  0xf1   : > { %v533_v21 = vpop.eup %532 }
  0xf2   : > { %v535_v22 = vpop.eup %534  ;;  %265 = vadd.xlane.f32.xlu1 %v533_v21  ;;  %289 = vadd.xlane.f32.xlu0 %v284_v20 }
  0xf3   : > { %261 = vadd.xlane.f32.xlu2 %v535_v22 }
  0xfa   : > { %279 = vadd.xlane.f32.xlu1 %v237_v25  ;;  %293 = vadd.xlane.f32.xlu0 %v286_v24 }
  0xfb   : > { %287 = vadd.xlane.f32.xlu2 %v283_v26 }
 0x102   : > { %281 = vadd.xlane.f32.xlu1 %v238_v23 }
 0x103   : > { %291 = vadd.xlane.f32.xlu2 %v285_v27 }
 0x15d   : > { %v264_v31 = vpop.xlane.xlu0 %263 }
 0x15e   : > { %v260_v30 = vpop.xlane.xlu2 %259 }
 0x15f   : > { %536 = vlog2.f32 %v260_v30 }
 0x160   : > { %538 = vlog2.f32 %v264_v31 }
 0x165   : > { %v537_v32 = vpop.eup %536  ;;  %v266_v33 = vpop.xlane.xlu1 %265 }
 0x166   : > { %v268_v35 = vmul.f32 0.6931472, %v537_v32  ;;  %540 = vlog2.f32 %v266_v33  ;;  %v262_v36 = vpop.xlane.xlu2 %261  ;;  %v539_v40 = vpop.eup %538 }
 0x167   : > { %542 = vlog2.f32 %v262_v36  ;;  %v290_v42 = vpop.xlane.xlu0 %289  ;;  %v272_v51 = vmul.f32 0.6931472, %v539_v40 }
 0x168   : > { %v295_v38 = vadd.f32 %v268_v35, %v240_v7 }
 0x169   : > { %v297_v59 = vadd.f32 %v272_v51, %v888_v6 }
 0x16a   : > { %v299_v48 = vmul.f32 %v295_v38, %v276_v28 }
 0x16c   : > { %v541_v43 = vpop.eup %540 }
 0x16d   : > { %v543_v44 = vpop.eup %542  ;;  %v280_v45 = vpop.xlane.xlu1 %279  ;;  %v274_v54 = vmul.f32 0.6931472, %v541_v43 }
 0x16e   : > { %v270_v47 = vmul.f32 0.6931472, %v543_v44  ;;  %v288_v49 = vpop.xlane.xlu2 %287  ;;  %v301_v0 = vmul.f32 %v297_v59, %v280_v45 }
 0x16f   : > { %v303_v56 = vsub.f32 %v299_v48, %v288_v49  ;;  %v298_v63 = vadd.f32 %v274_v54, %v891_v12  ;;  %v294_v2 = vpop.xlane.xlu0 %293 }
 0x170   : > { %v296_v55 = vadd.f32 %v270_v47, %v242_v13 }
 0x171   : > { %v321_v61 = vsel %vm317_vm0, %v303_v56, 0.0 }
 0x172   : > { %v300_v57 = vmul.f32 %v296_v55, %v278_v29  ;;  %v326_v7 = vsel %vm325_vm2, %v321_v61, 0.0 }
 0x174   : > { %v304_v62 = vsub.f32 %v300_v57, %v290_v42 }
 0x175   : > { %v282_v1 = vpop.xlane.xlu1 %281 }
 0x176   : > { %v322_v3 = vsel %vm318_vm1, %v304_v62, 0.0  ;;  %v302_v4 = vmul.f32 %v298_v63, %v282_v1  ;;  %v292_v5 = vpop.xlane.xlu2 %291 }
 0x177   : > { %v327_v8 = vsel %vm325_vm2, %v322_v3, 0.0  ;;  %v305_v9 = vsub.f32 %v301_v0, %v292_v5 }
 0x178   : > { %v328_v6 = vadd.f32 %v327_v8, %v326_v7  ;;  %v306_v10 = vsub.f32 %v302_v4, %v294_v2 }
 0x179   : > { %v323_v11 = vsel %vm319_vm3, %v305_v9, 0.0 }
 0x17a   : > { %v329_v12 = vsel %vm325_vm2, %v323_v11, 0.0  ;;  %v324_v13 = vsel %vm320_vm4, %v306_v10, 0.0 }
 0x17b   : > { %v330_v14 = vadd.f32 %v329_v12, %v328_v6  ;;  %v331_v15 = vsel %vm325_vm2, %v324_v13, 0.0 }
 0x17d   : > { %v332_v16 = vadd.f32 %v331_v15, %v330_v14 }
 0x17f   : > { %333 = vadd.xlane.f32.xlu1 %v332_v16 }
 0x1f2   : > { %v334_v17 = vpop.xlane.xlu1 %333 }
 0x1f3   : > { %v335_v18 = vrot.slane %v334_v17, 4 }
 0x1f5   : > { %v336_v19 = vadd.f32 %v335_v18, %v334_v17 }
 0x1f7   : > { %v337_v20 = vrot.slane %v336_v19, 2 }
 0x1f9   : > { %v338_v21 = vadd.f32 %v337_v20, %v336_v19 }
 0x1fb   : > { %v339_v22 = vrot.slane %v338_v21, 1 }
 0x1fd   : > { %v340_v23 = vadd.f32 %v339_v22, %v338_v21 }
 0x1ff   : > { %481 = vpush %v340_v23 }
 0x230   : > { %s482_s16 = spop %481 }
 0x231   : > { %v342_v24 = vstv %s482_s16 }
 0x232   : > { %343 = vst [vmem:[%s219_s26] sm:$0xff] %v342_v24 }
 0x233   : > { %649 = shalt.err (!%p646_p0)
}
 0x234   : > { %485 = dma.vmem_to_hbm [thread:$0]  (%p763_p9), %s358_s30, 128, %s360_s14, %s345_s17  }
 0x235 PF: > { %s371_s24 = sand.u32 1, %s680_s9   ;;  %p947_p1 = scmp.ne.s32.totalorder %s944_s22, 0 }
 0x236   : > { %p948_p10 = scmp.ge.s32.totalorder %s692_s12, 2  ;;  %s372_s7 = scalar_lea.sflag [#allocation4], %s371_s24 }
 0x238   : > { %p488_p11 = pnand %p948_p10, %p947_p1 }
 0x23a   : > { %p489_p13 = pneg %p488_p11 }
 0x23c   : > { %675 = dma.done.wait (%p489_p13), %s372_s7, 128  }
 0x23d   : > { %677 = vsyncadd (%p489_p13), %s372_s7, 4294967168  ;;  %p18_p2 = scmp.ge.s32.totalorder %s740_s15, 4   ;;  %s949_s9 = smov %s684_s10 }
 0x23e   : > { %s950_s10 = smov %s688_s11  ;;  %s951_s11 = smov %s752_s18 }
 0x23f   : > { %s952_s12 = smov %s740_s15  ;;  %20 = sbr.rel (!%p18_p2) target bundleno = 7 (0x7), region = 86 }
 0x244   :  { %378 = vsyncpa [#allocation3], 1 }
 0x245   :  { %380 = vsyncpa [#allocation3 + $0x1], 1 }
 0x246   :  { %381 = vsyncpa [#allocation6], 1 }
 0x247   :  { %383 = vsyncpa [#allocation6 + $0x1], 1 }
 0x248   :  { %384 = vsyncpa [#allocation4], 1 }
 0x249   :  { %386 = vsyncpa [#allocation4 + $0x1], 1 }

</bundles_post_ra>
